<compile_context>
chip_gen: v7x
topology: tpu7x:2x2x1
jax: 0.10.0
libtpu: 0.0.40
codegen_flags: <defaults>
</compile_context>

<pallas_src>
import functools
import math

import jax
import jax.numpy as jnp
from jax.experimental import pallas as pl
from jax.experimental.pallas import tpu as pltpu


def _pick_tile(n, candidates):
    """Largest preferred tile that divides n, else fall back to full n."""
    for c in candidates:
        if n % c == 0:
            return c
    return n


def _vmem_limit_bytes():
    """Generation-aware scoped-VMEM cap (v7x only has 64 MiB physical VMEM)."""
    default = 48 * 1024 * 1024
    try:
        cap = int(getattr(pltpu.get_tpu_info(), "vmem_capacity_bytes", 0) or 0)
    except Exception:
        return default
    if cap <= 0:
        return default
    # ~60% of physical VMEM, clamped to [32, 64] MiB (v5e/v6e: 64 MiB,
    # v7x: ~38 MiB) to leave headroom for Mosaic internal scratch.
    return max(32 * 1024 * 1024, min(int(cap * 0.6), 64 * 1024 * 1024))


def _weight_spec(block_shape, index_map, single_buffer):
    """BlockSpec for (mostly) grid-invariant operands.

    Single-buffering them halves weight VMEM residency (double buffering a
    constant-index block is pure waste)."""
    if single_buffer:
        return pl.BlockSpec(block_shape, index_map, pipeline_mode=pl.Buffered(1))
    return pl.BlockSpec(block_shape, index_map)


# --------------------------------------------------------------------------
# Kernel 1: QKV projection, one of {q, k, v} per grid step (grid axis s).
# Scale 1/sqrt(D) is pre-folded into the q weights/bias by the wrapper.
# --------------------------------------------------------------------------
def _qkv_proj_kernel(x_ref, w_ref, b_ref, o_ref):
    x = x_ref[0]                                            # (tn, C) bf16
    w = w_ref[0]                                            # (C, C)  bf16
    y = jnp.dot(x, w, preferred_element_type=jnp.float32) + b_ref[0]   # (tn, C) f32

    H = o_ref.shape[2]
    D = o_ref.shape[-1]
    # TODO(synk): for D < 128 these per-head column slices produce lane-masked
    # stores; full-size AIMv2 has D == 128 where they are lane-dense copies.
    for h in range(H):
        o_ref[0, 0, h] = y[:, h * D:(h + 1) * D].astype(o_ref.dtype)


# --------------------------------------------------------------------------
# Kernel 2: flash attention (in-kernel head loop + KV loop, stats in values)
#           fused with the output projection against a resident Wproj^T.
# --------------------------------------------------------------------------
def _flash_proj_kernel(q_ref, k_ref, v_ref, wp_ref, bp_ref, o_ref, attn_sc,
                       *, kv_chunk: int):
    H = q_ref.shape[2]
    tq = q_ref.shape[3]
    D = q_ref.shape[4]
    n_kv = k_ref.shape[3]
    num_chunks = n_kv // kv_chunk

    for h in range(H):                                       # static unroll (small H)
        q_h = q_ref[0, 0, h]                                 # (tq, D) bf16, pre-scaled

        def kv_step(j, carry, h=h, q_h=q_h):
            m, l, acc = carry
            start = pl.multiple_of(j * kv_chunk, kv_chunk)
            k_j = k_ref[0, 0, h, pl.ds(start, kv_chunk), :]  # (tk, D) bf16
            v_j = v_ref[0, 0, h, pl.ds(start, kv_chunk), :]  # (tk, D) bf16
            s = jax.lax.dot_general(q_h, k_j, (((1,), (1,)), ((), ())),
                                    preferred_element_type=jnp.float32)  # (tq, tk) f32
            m_new = jnp.maximum(m, jnp.max(s, axis=-1, keepdims=True))
            alpha = jnp.exp(m - m_new)
            p = jnp.exp(s - m_new)                           # unnormalized probs (f32)
            l_new = alpha * l + jnp.sum(p, axis=-1, keepdims=True)
            acc_new = alpha * acc + jnp.dot(p.astype(v_j.dtype), v_j,
                                            preferred_element_type=jnp.float32)
            return m_new, l_new, acc_new

        m0 = jnp.full((tq, 1), -jnp.inf, dtype=jnp.float32)
        l0 = jnp.zeros((tq, 1), dtype=jnp.float32)
        a0 = jnp.zeros((tq, D), dtype=jnp.float32)
        _, l, acc = jax.lax.fori_loop(0, num_chunks, kv_step, (m0, l0, a0))

        inv_l = pl.reciprocal(l, approx=False)               # exact recip (EUP, ~free)
        attn_sc[:, h * D:(h + 1) * D] = (acc * inv_l).astype(attn_sc.dtype)

    # Single big projection: lane-dense (tq, C) slab @ resident (C, C) Wproj^T.
    out = jnp.dot(attn_sc[...], wp_ref[...], preferred_element_type=jnp.float32)
    o_ref[0] = (out + bp_ref[...]).astype(o_ref.dtype)


# --------------------------------------------------------------------------
# Wrapper
# --------------------------------------------------------------------------
def aimv2_attention(x, w_qkv, b_qkv, w_proj, b_proj, *, num_heads: int,
                    seq_block=None, q_block=None, kv_block=None):
    """x: (B, N, C).  Weights in PyTorch Linear layout: w_qkv (3C, C), w_proj (C, C)."""
    B, N, C = x.shape
    H = num_heads
    assert C % H == 0, "hidden_size must be divisible by num_attention_heads"
    D = C // H
    scale = 1.0 / math.sqrt(D)

    cdt = jnp.bfloat16
    x_c = jnp.asarray(x).astype(cdt)

    # Per-part transposed weights: (3, C, C) with [s] = W_s^T (in_dim, out_dim).
    # Fold 1/sqrt(D) into the q part (s == 0) so the kernels never branch on s.
    sfac = jnp.asarray([scale, 1.0, 1.0], dtype=jnp.float32)[:, None, None]
    w_split = jnp.transpose(jnp.asarray(w_qkv, dtype=jnp.float32).reshape(3, C, C),
                            (0, 2, 1))
    w_split = (w_split * sfac).astype(cdt)                              # (3, C, C) bf16
    b_split = (jnp.asarray(b_qkv, dtype=jnp.float32).reshape(3, 1, C) * sfac)  # f32

    wproj_t = jnp.asarray(w_proj).T.astype(cdt)                         # (C, C) bf16
    bproj2 = jnp.asarray(b_proj).reshape(1, C).astype(jnp.float32)      # (1, C) f32

    tn = seq_block if seq_block is not None else _pick_tile(N, (256, 128))
    tq = q_block if q_block is not None else _pick_tile(N, (128, 256))
    tk = kv_block if kv_block is not None else _pick_tile(N, (128, 256))
    assert N % tn == 0 and N % tq == 0 and N % tk == 0

    vmem_cap = _vmem_limit_bytes()
    out_dtype = x.dtype

    def run(single_buffer_weights: bool):
        # ---- 1) QKV projection -> head-major (3, B, H, N, D), q pre-scaled ----
        qkv_heads = pl.pallas_call(
            _qkv_proj_kernel,
            out_shape=jax.ShapeDtypeStruct((3, B, H, N, D), cdt),
            grid_spec=pltpu.PrefetchScalarGridSpec(
                num_scalar_prefetch=0,
                grid=(3, B, N // tn),
                in_specs=[
                    pl.BlockSpec((1, tn, C), lambda s, b, t: (b, t, 0)),      # x
                    _weight_spec((1, C, C), lambda s, b, t: (s, 0, 0),
                                 single_buffer_weights),                       # W_s^T
                    _weight_spec((1, 1, C), lambda s, b, t: (s, 0, 0),
                                 single_buffer_weights),                       # b_s
                ],
                out_specs=pl.BlockSpec((1, 1, H, tn, D),
                                       lambda s, b, t: (s, b, 0, t, 0)),
            ),
            compiler_params=pltpu.CompilerParams(
                dimension_semantics=("arbitrary", "parallel", "parallel"),
                vmem_limit_bytes=vmem_cap),
            cost_estimate=pl.CostEstimate(
                flops=2 * B * N * C * 3 * C,
                transcendentals=0,
                bytes_accessed=(3 * x_c.size * 2 + 3 * C * C * 2 + 3 * C * 4
                                + 3 * B * H * N * D * 2)),
        )(x_c, w_split, b_split)

        # ---- 2) flash attention + fused output projection --------------------
        flash_kernel = functools.partial(_flash_proj_kernel, kv_chunk=tk)
        out = pl.pallas_call(
            flash_kernel,
            out_shape=jax.ShapeDtypeStruct((B, N, C), out_dtype),
            grid_spec=pltpu.PrefetchScalarGridSpec(
                num_scalar_prefetch=0,
                grid=(B, N // tq),
                in_specs=[
                    # q tile: heads for this (b, qi) query tile
                    pl.BlockSpec((1, 1, H, tq, D), lambda b, qi: (0, b, 0, qi, 0)),
                    # full-N K and V for this batch element (small for ViT sizes)
                    pl.BlockSpec((1, 1, H, N, D), lambda b, qi: (1, b, 0, 0, 0)),
                    pl.BlockSpec((1, 1, H, N, D), lambda b, qi: (2, b, 0, 0, 0)),
                    # fully resident, single-buffered projection weight / bias
                    _weight_spec((C, C), lambda b, qi: (0, 0), single_buffer_weights),
                    _weight_spec((1, C), lambda b, qi: (0, 0), single_buffer_weights),
                ],
                out_specs=pl.BlockSpec((1, tq, C), lambda b, qi: (b, qi, 0)),
                scratch_shapes=[
                    pltpu.VMEM((tq, C), cdt),     # lane-dense per-tile attention slab
                ],
            ),
            compiler_params=pltpu.CompilerParams(
                dimension_semantics=("parallel", "parallel"),
                vmem_limit_bytes=vmem_cap),
            cost_estimate=pl.CostEstimate(
                flops=4 * B * H * N * N * D + 2 * B * N * C * C,
                transcendentals=B * H * N * N,
                bytes_accessed=(3 * B * N * C * 2 + C * C * 2 + C * 4
                                + B * N * C * jnp.dtype(out_dtype).itemsize)),
        )(qkv_heads, qkv_heads, qkv_heads, wproj_t, bproj2)
        return jax.block_until_ready(out)

    try:
        return run(True)
    except Exception:
        # Fallback if pipeline_mode=pl.Buffered(1) is unsupported by this jax build.
        return run(False)


# --------------------------------------------------------------------------
# Pure-JAX reference mirroring the PyTorch forward
# --------------------------------------------------------------------------
def _reference(x, w_qkv, b_qkv, w_proj, b_proj, num_heads):
    B, N, C = x.shape
    H = num_heads
    D = C // H
    qkv = x @ w_qkv.T + b_qkv                                    # (B, N, 3C)
    qkv = qkv.reshape(B, N, 3, H, D).transpose(2, 0, 3, 1, 4)    # (3, B, H, N, D)
    q, k, v = qkv[0], qkv[1], qkv[2]
    s = jnp.einsum('bhnd,bhmd->bhnm', q, k) / math.sqrt(D)
    p = jax.nn.softmax(s, axis=-1)
    o = jnp.einsum('bhnm,bhmd->bhnd', p, v)
    o = o.transpose(0, 2, 1, 3).reshape(B, N, C)
    return o @ w_proj.T + b_proj


def _run_case(key, B, N, C, H, *, q_block=None, kv_block=None, atol=2e-2):
    kx, kw1, kb1, kw2, kb2 = jax.random.split(key, 5)
    x = jax.random.normal(kx, (B, N, C), dtype=jnp.float32)
    w_qkv = jax.random.normal(kw1, (3 * C, C), dtype=jnp.float32) * 0.05
    b_qkv = jax.random.normal(kb1, (3 * C,), dtype=jnp.float32) * 0.05
    w_proj = jax.random.normal(kw2, (C, C), dtype=jnp.float32) * 0.05
    b_proj = jax.random.normal(kb2, (C,), dtype=jnp.float32) * 0.05

    out = aimv2_attention(x, w_qkv, b_qkv, w_proj, b_proj, num_heads=H,
                          q_block=q_block, kv_block=kv_block)
    out = jax.block_until_ready(out)

    ref = _reference(x, w_qkv, b_qkv, w_proj, b_proj, H)
    assert out.shape == (B, N, C)
    err = jnp.max(jnp.abs(out.astype(jnp.float32) - ref))
    # bf16 MXU operands => relaxed tolerance vs f32 reference.
    assert jnp.allclose(out.astype(jnp.float32), ref, atol=atol, rtol=atol), \
        f"max abs err {err}"
    return float(err)


if __name__ == "__main__":
    key = jax.random.PRNGKey(0)
    k1, k2 = jax.random.split(key)

    # Config consistent with the module (hidden_size=32, num_heads=4,
    # qkv_bias=True, use_bias=True, dropouts=0.0): single-tile path.
    _run_case(k1, B=2, N=8, C=32, H=4, atol=2e-2)

    # Multi-tile path: 2 query tiles x 2 in-kernel KV chunks, 4 heads,
    # exercises the head loop, the KV fori_loop and the fused projection.
    _run_case(k2, B=1, N=256, C=128, H=4, q_block=128, kv_block=128, atol=5e-2)

    print("KERNEL_OK")
</pallas_src>

<mosaic_0001>
module attributes {stable_mosaic.version = 11 : i64} {
  func.func @_qkv_proj_kernel(%arg0: i32, %arg1: i32, %arg2: i32, %arg3: memref<1x8x32xbf16, #tpu.memory_space<vmem>>, %arg4: memref<1x32x32xbf16, #tpu.memory_space<vmem>>, %arg5: memref<1x1x32xf32, #tpu.memory_space<vmem>>, %arg6: memref<1x1x4x8x8xbf16, #tpu.memory_space<vmem>>) attributes {dimension_semantics = [#tpu.dimension_semantics<arbitrary>, #tpu.dimension_semantics<parallel>, #tpu.dimension_semantics<parallel>], iteration_bounds = array<i64: 3, 2, 1>, scalar_prefetch = 0 : i64, scratch_operands = 0 : i64, tpu.core_type = #tpu.core_type<tc>, window_params = [{transform_indices = @transform_0, window_bounds = array<i64: 1, 8, 32>}, {pipeline_mode = #tpu.pipeline_mode<synchronous>, transform_indices = @transform_1, window_bounds = array<i64: 1, 32, 32>}, {pipeline_mode = #tpu.pipeline_mode<synchronous>, transform_indices = @transform_2, window_bounds = array<i64: 1, 1, 32>}, {transform_indices = @transform_3, window_bounds = array<i64: 1, 1, 4, 8, 8>}]} {
    %c0 = arith.constant 0 : index
    %c0_0 = arith.constant 0 : index
    %c0_1 = arith.constant 0 : index
    %0 = vector.load %arg3[%c0, %c0_0, %c0_1] : memref<1x8x32xbf16, #tpu.memory_space<vmem>>, vector<1x8x32xbf16>
    %1 = vector.shape_cast %0 : vector<1x8x32xbf16> to vector<8x32xbf16>
    %c0_2 = arith.constant 0 : index
    %c0_3 = arith.constant 0 : index
    %c0_4 = arith.constant 0 : index
    %2 = vector.load %arg4[%c0_2, %c0_3, %c0_4] : memref<1x32x32xbf16, #tpu.memory_space<vmem>>, vector<1x32x32xbf16>
    %3 = vector.shape_cast %2 : vector<1x32x32xbf16> to vector<32x32xbf16>
    %cst = arith.constant dense<0.000000e+00> : vector<8x32xf32>
    %4 = tpu.matmul %1, %3, %cst {dimension_numbers = #tpu.dot_dimension_numbers<[1], [0], [0], [1], [0, 0, 1, 1], [], []>} : vector<8x32xbf16>, vector<32x32xbf16>, vector<8x32xf32> -> vector<8x32xf32>
    %c0_5 = arith.constant 0 : index
    %c0_6 = arith.constant 0 : index
    %c0_7 = arith.constant 0 : index
    %5 = vector.load %arg5[%c0_5, %c0_6, %c0_7] : memref<1x1x32xf32, #tpu.memory_space<vmem>>, vector<1x1x32xf32>
    %6 = vector.shape_cast %5 : vector<1x1x32xf32> to vector<1x32xf32>
    %7 = vector.broadcast %6 : vector<1x32xf32> to vector<8x32xf32>
    %8 = arith.addf %4, %7 : vector<8x32xf32>
    %9 = vector.extract_strided_slice %8 {offsets = [0, 0], sizes = [8, 8], strides = [1, 1]} : vector<8x32xf32> to vector<8x8xf32>
    %10 = arith.truncf %9 : vector<8x8xf32> to vector<8x8xbf16>
    %c0_8 = arith.constant 0 : index
    %c0_9 = arith.constant 0 : index
    %c0_10 = arith.constant 0 : index
    %c0_11 = arith.constant 0 : index
    %c0_12 = arith.constant 0 : index
    %11 = vector.load %arg6[%c0_8, %c0_9, %c0_10, %c0_11, %c0_12] : memref<1x1x4x8x8xbf16, #tpu.memory_space<vmem>>, vector<1x1x1x8x8xbf16>
    %12 = vector.shape_cast %11 : vector<1x1x1x8x8xbf16> to vector<8x8xbf16>
    %13 = vector.shape_cast %10 : vector<8x8xbf16> to vector<1x1x1x8x8xbf16>
    tpu.vector_store %arg6[%c0_8, %c0_9, %c0_10, %c0_11, %c0_12], %13 {strides = array<i32>} : memref<1x1x4x8x8xbf16, #tpu.memory_space<vmem>>, vector<1x1x1x8x8xbf16>,
    %14 = vector.extract_strided_slice %8 {offsets = [0, 8], sizes = [8, 8], strides = [1, 1]} : vector<8x32xf32> to vector<8x8xf32>
    %15 = arith.truncf %14 : vector<8x8xf32> to vector<8x8xbf16>
    %c0_13 = arith.constant 0 : index
    %c0_14 = arith.constant 0 : index
    %c1 = arith.constant 1 : index
    %c0_15 = arith.constant 0 : index
    %c0_16 = arith.constant 0 : index
    %16 = vector.load %arg6[%c0_13, %c0_14, %c1, %c0_15, %c0_16] : memref<1x1x4x8x8xbf16, #tpu.memory_space<vmem>>, vector<1x1x1x8x8xbf16>
    %17 = vector.shape_cast %16 : vector<1x1x1x8x8xbf16> to vector<8x8xbf16>
    %18 = vector.shape_cast %15 : vector<8x8xbf16> to vector<1x1x1x8x8xbf16>
    tpu.vector_store %arg6[%c0_13, %c0_14, %c1, %c0_15, %c0_16], %18 {strides = array<i32>} : memref<1x1x4x8x8xbf16, #tpu.memory_space<vmem>>, vector<1x1x1x8x8xbf16>,
    %19 = vector.extract_strided_slice %8 {offsets = [0, 16], sizes = [8, 8], strides = [1, 1]} : vector<8x32xf32> to vector<8x8xf32>
    %20 = arith.truncf %19 : vector<8x8xf32> to vector<8x8xbf16>
    %c0_17 = arith.constant 0 : index
    %c0_18 = arith.constant 0 : index
    %c2 = arith.constant 2 : index
    %c0_19 = arith.constant 0 : index
    %c0_20 = arith.constant 0 : index
    %21 = vector.load %arg6[%c0_17, %c0_18, %c2, %c0_19, %c0_20] : memref<1x1x4x8x8xbf16, #tpu.memory_space<vmem>>, vector<1x1x1x8x8xbf16>
    %22 = vector.shape_cast %21 : vector<1x1x1x8x8xbf16> to vector<8x8xbf16>
    %23 = vector.shape_cast %20 : vector<8x8xbf16> to vector<1x1x1x8x8xbf16>
    tpu.vector_store %arg6[%c0_17, %c0_18, %c2, %c0_19, %c0_20], %23 {strides = array<i32>} : memref<1x1x4x8x8xbf16, #tpu.memory_space<vmem>>, vector<1x1x1x8x8xbf16>,
    %24 = vector.extract_strided_slice %8 {offsets = [0, 24], sizes = [8, 8], strides = [1, 1]} : vector<8x32xf32> to vector<8x8xf32>
    %25 = arith.truncf %24 : vector<8x8xf32> to vector<8x8xbf16>
    %c0_21 = arith.constant 0 : index
    %c0_22 = arith.constant 0 : index
    %c3 = arith.constant 3 : index
    %c0_23 = arith.constant 0 : index
    %c0_24 = arith.constant 0 : index
    %26 = vector.load %arg6[%c0_21, %c0_22, %c3, %c0_23, %c0_24] : memref<1x1x4x8x8xbf16, #tpu.memory_space<vmem>>, vector<1x1x1x8x8xbf16>
    %27 = vector.shape_cast %26 : vector<1x1x1x8x8xbf16> to vector<8x8xbf16>
    %28 = vector.shape_cast %25 : vector<8x8xbf16> to vector<1x1x1x8x8xbf16>
    tpu.vector_store %arg6[%c0_21, %c0_22, %c3, %c0_23, %c0_24], %28 {strides = array<i32>} : memref<1x1x4x8x8xbf16, #tpu.memory_space<vmem>>, vector<1x1x1x8x8xbf16>,
    return
  }
  func.func @transform_0(%arg0: i32, %arg1: i32, %arg2: i32) -> (i32, i32, i32) {
    %c0_i32 = arith.constant 0 : i32
    %c0_i32_0 = arith.constant 0 : i32
    return %arg1, %arg2, %c0_i32 : i32, i32, i32
  }
  func.func @transform_1(%arg0: i32, %arg1: i32, %arg2: i32) -> (i32, i32, i32) {
    %c0_i32 = arith.constant 0 : i32
    %c0_i32_0 = arith.constant 0 : i32
    %c0_i32_1 = arith.constant 0 : i32
    return %arg0, %c0_i32, %c0_i32_0 : i32, i32, i32
  }
  func.func @transform_2(%arg0: i32, %arg1: i32, %arg2: i32) -> (i32, i32, i32) {
    %c0_i32 = arith.constant 0 : i32
    %c0_i32_0 = arith.constant 0 : i32
    %c0_i32_1 = arith.constant 0 : i32
    return %arg0, %c0_i32, %c0_i32_0 : i32, i32, i32
  }
  func.func @transform_3(%arg0: i32, %arg1: i32, %arg2: i32) -> (i32, i32, i32, i32, i32) {
    %c0_i32 = arith.constant 0 : i32
    %c0_i32_0 = arith.constant 0 : i32
    %c0_i32_1 = arith.constant 0 : i32
    return %arg0, %arg1, %c0_i32, %arg2, %c0_i32_0 : i32, i32, i32, i32, i32
  }
}

module attributes {stable_mosaic.version = 11 : i64} {
  func.func @_qkv_proj_kernel(%arg0: i32, %arg1: i32, %arg2: i32, %arg3: memref<1x8x32xbf16, #tpu.memory_space<vmem>>, %arg4: memref<1x32x32xbf16, #tpu.memory_space<vmem>>, %arg5: memref<1x1x32xf32, #tpu.memory_space<vmem>>, %arg6: memref<1x1x4x8x8xbf16, #tpu.memory_space<vmem>>) attributes {dimension_semantics = [#tpu.dimension_semantics<arbitrary>, #tpu.dimension_semantics<parallel>, #tpu.dimension_semantics<parallel>], iteration_bounds = array<i64: 3, 2, 1>, scalar_prefetch = 0 : i64, scratch_operands = 0 : i64, tpu.core_type = #tpu.core_type<tc>, window_params = [{transform_indices = @transform_0, window_bounds = array<i64: 1, 8, 32>}, {transform_indices = @transform_1, window_bounds = array<i64: 1, 32, 32>}, {transform_indices = @transform_2, window_bounds = array<i64: 1, 1, 32>}, {transform_indices = @transform_3, window_bounds = array<i64: 1, 1, 4, 8, 8>}]} {
    %c0 = arith.constant 0 : index
    %c0_0 = arith.constant 0 : index
    %c0_1 = arith.constant 0 : index
    %0 = vector.load %arg3[%c0, %c0_0, %c0_1] : memref<1x8x32xbf16, #tpu.memory_space<vmem>>, vector<1x8x32xbf16>
    %1 = vector.shape_cast %0 : vector<1x8x32xbf16> to vector<8x32xbf16>
    %c0_2 = arith.constant 0 : index
    %c0_3 = arith.constant 0 : index
    %c0_4 = arith.constant 0 : index
    %2 = vector.load %arg4[%c0_2, %c0_3, %c0_4] : memref<1x32x32xbf16, #tpu.memory_space<vmem>>, vector<1x32x32xbf16>
    %3 = vector.shape_cast %2 : vector<1x32x32xbf16> to vector<32x32xbf16>
    %cst = arith.constant dense<0.000000e+00> : vector<8x32xf32>
    %4 = tpu.matmul %1, %3, %cst {dimension_numbers = #tpu.dot_dimension_numbers<[1], [0], [0], [1], [0, 0, 1, 1], [], []>} : vector<8x32xbf16>, vector<32x32xbf16>, vector<8x32xf32> -> vector<8x32xf32>
    %c0_5 = arith.constant 0 : index
    %c0_6 = arith.constant 0 : index
    %c0_7 = arith.constant 0 : index
    %5 = vector.load %arg5[%c0_5, %c0_6, %c0_7] : memref<1x1x32xf32, #tpu.memory_space<vmem>>, vector<1x1x32xf32>
    %6 = vector.shape_cast %5 : vector<1x1x32xf32> to vector<1x32xf32>
    %7 = vector.broadcast %6 : vector<1x32xf32> to vector<8x32xf32>
    %8 = arith.addf %4, %7 : vector<8x32xf32>
    %9 = vector.extract_strided_slice %8 {offsets = [0, 0], sizes = [8, 8], strides = [1, 1]} : vector<8x32xf32> to vector<8x8xf32>
    %10 = arith.truncf %9 : vector<8x8xf32> to vector<8x8xbf16>
    %c0_8 = arith.constant 0 : index
    %c0_9 = arith.constant 0 : index
    %c0_10 = arith.constant 0 : index
    %c0_11 = arith.constant 0 : index
    %c0_12 = arith.constant 0 : index
    %11 = vector.load %arg6[%c0_8, %c0_9, %c0_10, %c0_11, %c0_12] : memref<1x1x4x8x8xbf16, #tpu.memory_space<vmem>>, vector<1x1x1x8x8xbf16>
    %12 = vector.shape_cast %11 : vector<1x1x1x8x8xbf16> to vector<8x8xbf16>
    %13 = vector.shape_cast %10 : vector<8x8xbf16> to vector<1x1x1x8x8xbf16>
    tpu.vector_store %arg6[%c0_8, %c0_9, %c0_10, %c0_11, %c0_12], %13 {strides = array<i32>} : memref<1x1x4x8x8xbf16, #tpu.memory_space<vmem>>, vector<1x1x1x8x8xbf16>,
    %14 = vector.extract_strided_slice %8 {offsets = [0, 8], sizes = [8, 8], strides = [1, 1]} : vector<8x32xf32> to vector<8x8xf32>
    %15 = arith.truncf %14 : vector<8x8xf32> to vector<8x8xbf16>
    %c0_13 = arith.constant 0 : index
    %c0_14 = arith.constant 0 : index
    %c1 = arith.constant 1 : index
    %c0_15 = arith.constant 0 : index
    %c0_16 = arith.constant 0 : index
    %16 = vector.load %arg6[%c0_13, %c0_14, %c1, %c0_15, %c0_16] : memref<1x1x4x8x8xbf16, #tpu.memory_space<vmem>>, vector<1x1x1x8x8xbf16>
    %17 = vector.shape_cast %16 : vector<1x1x1x8x8xbf16> to vector<8x8xbf16>
    %18 = vector.shape_cast %15 : vector<8x8xbf16> to vector<1x1x1x8x8xbf16>
    tpu.vector_store %arg6[%c0_13, %c0_14, %c1, %c0_15, %c0_16], %18 {strides = array<i32>} : memref<1x1x4x8x8xbf16, #tpu.memory_space<vmem>>, vector<1x1x1x8x8xbf16>,
    %19 = vector.extract_strided_slice %8 {offsets = [0, 16], sizes = [8, 8], strides = [1, 1]} : vector<8x32xf32> to vector<8x8xf32>
    %20 = arith.truncf %19 : vector<8x8xf32> to vector<8x8xbf16>
    %c0_17 = arith.constant 0 : index
    %c0_18 = arith.constant 0 : index
    %c2 = arith.constant 2 : index
    %c0_19 = arith.constant 0 : index
    %c0_20 = arith.constant 0 : index
    %21 = vector.load %arg6[%c0_17, %c0_18, %c2, %c0_19, %c0_20] : memref<1x1x4x8x8xbf16, #tpu.memory_space<vmem>>, vector<1x1x1x8x8xbf16>
    %22 = vector.shape_cast %21 : vector<1x1x1x8x8xbf16> to vector<8x8xbf16>
    %23 = vector.shape_cast %20 : vector<8x8xbf16> to vector<1x1x1x8x8xbf16>
    tpu.vector_store %arg6[%c0_17, %c0_18, %c2, %c0_19, %c0_20], %23 {strides = array<i32>} : memref<1x1x4x8x8xbf16, #tpu.memory_space<vmem>>, vector<1x1x1x8x8xbf16>,
    %24 = vector.extract_strided_slice %8 {offsets = [0, 24], sizes = [8, 8], strides = [1, 1]} : vector<8x32xf32> to vector<8x8xf32>
    %25 = arith.truncf %24 : vector<8x8xf32> to vector<8x8xbf16>
    %c0_21 = arith.constant 0 : index
    %c0_22 = arith.constant 0 : index
    %c3 = arith.constant 3 : index
    %c0_23 = arith.constant 0 : index
    %c0_24 = arith.constant 0 : index
    %26 = vector.load %arg6[%c0_21, %c0_22, %c3, %c0_23, %c0_24] : memref<1x1x4x8x8xbf16, #tpu.memory_space<vmem>>, vector<1x1x1x8x8xbf16>
    %27 = vector.shape_cast %26 : vector<1x1x1x8x8xbf16> to vector<8x8xbf16>
    %28 = vector.shape_cast %25 : vector<8x8xbf16> to vector<1x1x1x8x8xbf16>
    tpu.vector_store %arg6[%c0_21, %c0_22, %c3, %c0_23, %c0_24], %28 {strides = array<i32>} : memref<1x1x4x8x8xbf16, #tpu.memory_space<vmem>>, vector<1x1x1x8x8xbf16>,
    return
  }
  func.func @transform_0(%arg0: i32, %arg1: i32, %arg2: i32) -> (i32, i32, i32) {
    %c0_i32 = arith.constant 0 : i32
    %c0_i32_0 = arith.constant 0 : i32
    return %arg1, %arg2, %c0_i32 : i32, i32, i32
  }
  func.func @transform_1(%arg0: i32, %arg1: i32, %arg2: i32) -> (i32, i32, i32) {
    %c0_i32 = arith.constant 0 : i32
    %c0_i32_0 = arith.constant 0 : i32
    %c0_i32_1 = arith.constant 0 : i32
    return %arg0, %c0_i32, %c0_i32_0 : i32, i32, i32
  }
  func.func @transform_2(%arg0: i32, %arg1: i32, %arg2: i32) -> (i32, i32, i32) {
    %c0_i32 = arith.constant 0 : i32
    %c0_i32_0 = arith.constant 0 : i32
    %c0_i32_1 = arith.constant 0 : i32
    return %arg0, %c0_i32, %c0_i32_0 : i32, i32, i32
  }
  func.func @transform_3(%arg0: i32, %arg1: i32, %arg2: i32) -> (i32, i32, i32, i32, i32) {
    %c0_i32 = arith.constant 0 : i32
    %c0_i32_0 = arith.constant 0 : i32
    %c0_i32_1 = arith.constant 0 : i32
    return %arg0, %arg1, %c0_i32, %arg2, %c0_i32_0 : i32, i32, i32, i32, i32
  }
}

</mosaic_0001>

<bundles_post_ra>
// kernel: tpu_custom_call.1
= control target key start
LH: loop header
LB: loop body
LE: loop exit
PB: predicated region body
PF: predicated region fallthrough
CT: control target
= control target key end

     0   :  { %s1234_s0 = inlined_call_operand.hbm [shape: bf16[2,8,32], index: 0, kind: input, shape index: {}]   ;;  %s1235_s1 = inlined_call_operand.hbm [shape: bf16[3,32,32], index: 1, kind: input, shape index: {}]   ;;  %s1236_s2 = inlined_call_operand.vmem [shape: f32[3,1,32], index: 2, kind: input, shape index: {}]   ;;  %s1237_s3 = inlined_call_operand.hbm [shape: bf16[3,2,4,8,8], index: 3, kind: output, shape index: {}]  }
   0x1   :  { %1248 = sst [smem:[#allocation17_spill]] %s1235_s1 }
   0x2   :  { %8 = vsyncpa [#allocation3], 0 }
   0x3   :  { %10 = vsyncpa [#allocation3 + $0x1], 0 }
   0x4   :  { %11 = vsyncpa [#allocation6], 0 }
   0x5   :  { %12 = vsyncpa [#allocation4], 0 }
   0x6   :  { %14 = vsyncpa [#allocation4 + $0x1], 0  ;;  %s898_s12 = smov 0   ;;  %s900_s13 = smov 0  }
   0x7   :  { %s902_s14 = smov 0   ;;  %s904_s15 = smov 0  }
   0x8   :  { %s906_s16 = smov 0   ;;  %s908_s17 = smov 0  }
   0x9   :  { %s910_s18 = smov 0   ;;  %s912_s19 = smov 0  }
   0xa   :  { %s914_s20 = smov 0   ;;  %s916_s21 = smov 0  }
   0xb   :  { %s918_s22 = smov 0   ;;  %s920_s23 = smov 0  }
   0xc   :  { %s922_s24 = smov 0   ;;  %s924_s25 = smov 0  }
   0xd LB: > { %1249 = sst [smem:[#allocation11_spill]] %s828_s16  ;;  %s472_s26 = sadd.s32 4294967295, %s864_s25   ;;  %s864_s25 = sphi %s924_s25, %s20_s25   ;;  %s860_s24 = sphi %s922_s24, %s1278_s24   ;;  %s856_s23 = sphi %s920_s23, %s1277_s23   ;;  %s852_s22 = sphi %s918_s22, %s1276_s22   ;;  %s848_s21 = sphi %s916_s21, %s1275_s21   ;;  %s844_s20 = sphi %s914_s20, %s1286_s20   ;;  %s840_s19 = sphi %s912_s19, %s1285_s19   ;;  %s836_s18 = sphi %s910_s18, %s1284_s18   ;;  %s832_s17 = sphi %s908_s17, %s1283_s17   ;;  %s828_s16 = sphi %s906_s16, %s1282_s16   ;;  %s824_s15 = sphi %s904_s15, %s1273_s15   ;;  %s820_s14 = sphi %s902_s14, %s1281_s14   ;;  %s816_s13 = sphi %s900_s13, %s1280_s13   ;;  %s812_s12 = sphi %s898_s12, %s1279_s12  }
   0xe   : > { %1250 = sst [smem:[#allocation12_spill]] %s856_s23  ;;  %p87_p0 = scmp.ne.s32.totalorder %s828_s16, %s824_s15 }
   0xf   : > { %1251 = sst [smem:[#allocation13_spill]] %s860_s24  ;;  %p968_p1 = scmp.eq.s32.totalorder %s472_s26, 0 }
  0x10   : > { %p972_p2 = scmp.eq.s32.totalorder %s472_s26, 5  ;;  %p474_p3 = scmp.ge.s32.totalorder %s864_s25, 1 }
  0x11   : > { %s1252_s27 = scalar_select %p968_p1, 1, 0 }
  0x12   : > { %s1253_s28 = scalar_select %p972_p2, 1, 0 }
  0x13   : > { %p154_p4 = scmp.lt.s32.totalorder %s864_s25, 7  ;;  %p980_p5 = por %p87_p0, %p968_p1 }
  0x14   : > { %s497_s30 = sshll.u32 %s852_s22, 8  ;;  %s1256_s1 = sld [smem:[#allocation17_spill]] }
  0x15   : > { %s1254_s29 = scalar_select %p980_p5, 1, 0 }
  0x16   : > { %p985_p6 = pnand %p474_p3, %p154_p4  ;;  %s866_s8 = smov [#allocation5]  }
  0x17   : > { %s169_s9 = sshll.u32 %s866_s8, 4  ;;  %s996_s9 = int_to_ptr.vmem [resolvable:$true] %s169_s9 }
  0x18   : > { %s1255_s4 = scalar_select %p985_p6, 1, 0 }
  0x19   : > { %p516_p7 = pneg %p985_p6 }
  0x1a   : > { %s992_s7 = scalar_lea.hbm %s1256_s1, %s497_s30  ;;  %s659_s30 = scalar_lea.hbm %s1256_s1, 768 }
  0x1b   : > { %p1000_p8 = pnand %p516_p7, %p980_p5  ;;  %s654_s11 = scalar_lea.hbm %s992_s7, 256 }
  0x1c   : > { %p655_p9 = scmp.ne.s32.totalorder %s992_s7, %s654_s11  ;;  %p660_p13 = scmp.lt.u32.totalorder %s992_s7, %s1256_s1 }
  0x1d   : > { %p656_p10 = pneg %p1000_p8  ;;  %p661_p0 = scmp.lt.u32.totalorder %s659_s30, %s654_s11 }
  0x1e   : > { %p663_p4 = scmp.lt.u32.totalorder %s654_s11, %s992_s7 }
  0x1f   : > { %p657_p11 = pnand %p656_p10, %p655_p9  ;;  %p662_p3 = por %p661_p0, %p660_p13 }
  0x21   : > { %p658_p12 = pneg %p657_p11  ;;  %p664_p7 = por %p663_p4, %p662_p3 }
  0x23   : > { %p665_p5 = pnand %p664_p7, %p658_p12 }
  0x25   : > { %668 = shalt.err (!%p665_p5)
}
  0x26   : > { %s669_s8 = scalar_lea.vmem %s996_s9, 256  ;;  %p677_p2 = scmp.lt.s32.totalorder %s996_s9, %s996_s9 }
  0x27   : > { %p670_p9 = scmp.ne.s32.totalorder %s996_s9, %s669_s8  ;;  %p678_p1 = scmp.lt.s32.totalorder %s669_s8, %s669_s8 }
  0x29   : > { %p672_p11 = pnand %p670_p9, %p656_p10  ;;  %p679_p0 = por %p678_p1, %p677_p2 }
  0x2b   : > { %p673_p6 = pneg %p672_p11 }
  0x2d   : > { %p680_p13 = pnand %p679_p0, %p673_p6 }
  0x2f   : > { %683 = shalt.err (!%p680_p13)
}
  0x30   : > { %s867_s11 = smov 64   ;;  %s868_s15 = smov 4  }
  0x31   : > { %519 = dma.hbm_to_vmem [thread:$0]  (!%p1000_p8), %s992_s7, 256, %s996_s9, [#allocation6], %s867_s11, %s867_s11, %s868_s15  }
  0x32   : > { %s473_s26 = sadd.s32 4294967294, %s864_s25   ;;  %s35_s30 = sadd.s32 1, %s856_s23 }
  0x33   : > { %s39_s5 = sadd.s32 1, %s860_s24  ;;  %p37_p1 = scmp.ge.s32.totalorder %s35_s30, 2 }
  0x34   : > { %s48_s6 = sadd.s32 1, %s844_s20  ;;  %p55_p2 = scmp.ne.s32.totalorder %s844_s20, %s840_s19 }
  0x35   : > { %p56_p5 = scmp.eq.s32.totalorder %s864_s25, 0  ;;  %s1288_s30 = smov (%p37_p1, %s35_s30), 0 }
  0x36   : > { %1258 = sst [smem:[#allocation14_spill]] %s1288_s30  ;;  %s1290_s5 = smov (!%p37_p1, %s39_s5), %s860_s24 }
  0x37   : > { %s43_s10 = ssub.s32 %s856_s23, %s1288_s30  ;;  %p1042_p6 = por %p56_p5, %p55_p2 }
  0x38   : > { %p41_p8 = scmp.ge.s32.totalorder %s1290_s5, 3  ;;  %p46_p10 = scmp.eq.s32.totalorder %s43_s10, 0 }
  0x39   : > { %p61_p12 = scmp.ne.s32.totalorder %s840_s19, %s836_s18  ;;  %s74_s9 = sadd.s32 1, %s832_s17 }
  0x3a   : > { %s1292_s5 = smov (%p41_p8, %s1290_s5), 0  ;;  %p1262_p3 = scmp.ne.s32.totalorder %s1252_s27, 0 }
  0x3b   : > { %1260 = sst [smem:[#allocation15_spill]] %s1292_s5  ;;  %s71_s15 = ssub.s32 %s860_s24, %s1292_s5 }
  0x3c   : > { %s1052_s8 = scalar_select %p46_p10, %s844_s20, %s48_s6  }
  0x3d   : > { %p1056_p4 = por %p1262_p3, %p61_p12  ;;  %p72_p7 = scmp.eq.s32.totalorder %s71_s15, 0 }
  0x3e   : > { %1261 = sst [smem:[#allocation16_spill]] %s1052_s8  ;;  %s125_s1 = sor.u32 %s71_s15, %s43_s10 }
  0x3f   : > { %p128_p9 = scmp.eq.s32.totalorder %s125_s1, 0  ;;  %s130_s18 = sadd.s32 1, %s820_s14 }
  0x40   : > { %s1064_s30 = scalar_select %p72_p7, %s832_s17, %s74_s9  }
  0x41   : > { %s1067_s16 = scalar_select %p128_p9, %s820_s14, %s130_s18  }
  0x42   : > { %p140_p11 = scmp.ne.s32.totalorder %s820_s14, %s816_s13  ;;  %p146_p0 = scmp.ne.s32.totalorder %s816_s13, %s812_s12 }
  0x43   : > { %p147_p13 = scmp.eq.s32.totalorder %s473_s26, 5  ;;  %p528_p1 = scmp.lt.s32.totalorder %s864_s25, 6 }
  0x44   : > { %p1264_p2 = scmp.ne.s32.totalorder %s1253_s28, 0  ;;  %s189_s6 = sand.u32 1, %s844_s20  }
  0x45   : > { %p1081_p8 = por %p147_p13, %p146_p0  ;;  %s478_s1 = sshll.u32 %s189_s6, 2 }
  0x46   : > { %p1076_p5 = por %p1264_p2, %p140_p11  ;;  %s479_s10 = sshll.u32 %s856_s23, 6 }
  0x47   : > { %s1266_s5 = scalar_select %p1081_p8, 1, 0 }
  0x48   : > { %s1265_s27 = scalar_select %p1076_p5, 1, 0 }
  0x49   : > { %s1089_s18 = scalar_lea.hbm %s1234_s0, %s479_s10  ;;  %s193_s28 = scalar_lea.vmem [#allocation2], %s478_s1 }
  0x4a   : > { %s201_s26 = sshll.u32 %s193_s28, 4  ;;  %p1093_p10 = pnand %p528_p1, %p1042_p6  ;;  %s1097_s26 = int_to_ptr.vmem [resolvable:$true] %s201_s26 }
  0x4b   : > { %s190_s23 = scalar_lea.sflag [#allocation3], %s189_s6  ;;  %s684_s8 = scalar_lea.hbm %s1089_s18, 64 }
  0x4c   : > { %p685_p12 = scmp.ne.s32.totalorder %s1089_s18, %s684_s8  ;;  %p686_p3 = pneg %p1093_p10 }
  0x4d   : > { %s689_s7 = scalar_lea.hbm %s1234_s0, 128  ;;  %p690_p6 = scmp.lt.u32.totalorder %s1089_s18, %s1234_s0 }
  0x4e   : > { %p687_p7 = pnand %p686_p3, %p685_p12  ;;  %p691_p11 = scmp.lt.u32.totalorder %s689_s7, %s684_s8 }
  0x4f   : > { %p693_p13 = scmp.lt.u32.totalorder %s684_s8, %s1089_s18 }
  0x50   : > { %p688_p9 = pneg %p687_p7  ;;  %p692_p0 = por %p691_p11, %p690_p6 }
  0x52   : > { %p694_p1 = por %p693_p13, %p692_p0 }
  0x54   : > { %p695_p2 = pnand %p694_p1, %p688_p9 }
  0x56   : > { %698 = shalt.err (!%p695_p2)
}
  0x57   : > { %s699_s6 = scalar_lea.vmem %s1097_s26, 64  ;;  %s869_s28 = smov [#allocation2]  }
  0x58   : > { %p700_p12 = scmp.ne.s32.totalorder %s1097_s26, %s699_s6  ;;  %s704_s1 = sshll.u32 %s869_s28, 4  ;;  %s705_s1 = int_to_ptr.vmem [resolvable:$false] %s704_s1 }
  0x59   : > { %s706_s10 = scalar_lea.vmem %s705_s1, 128  ;;  %p707_p5 = scmp.lt.s32.totalorder %s1097_s26, %s705_s1 }
  0x5a   : > { %p702_p7 = pnand %p700_p12, %p686_p3  ;;  %p708_p6 = scmp.lt.s32.totalorder %s706_s10, %s699_s6 }
  0x5c   : > { %p703_p8 = pneg %p702_p7  ;;  %p709_p11 = por %p708_p6, %p707_p5 }
  0x5e   : > { %p710_p0 = pnand %p709_p11, %p703_p8 }
  0x60   : > { %713 = shalt.err (!%p710_p0)
}
  0x61   : > { %523 = dma.hbm_to_vmem [thread:$0]  (!%p1093_p10), %s1089_s18, 64, %s1097_s26, %s190_s23  }
  0x62   : > { %p1268_p9 = scmp.ne.s32.totalorder %s1255_s4, 0 }
  0x63   : > { %s212_s8 = sand.u32 (!%p1268_p9), 1, %s840_s19  }
  0x64   : > { %210 = sbr.rel (%p1268_p9) target bundleno = 470 (0x1d6), region = 32  ;;  %s481_s7 = sshll.u32 (!%p1268_p9), %s212_s8, 2 }
  0x65   : > { %s213_s9 = scalar_lea.sflag (!%p1268_p9), [#allocation3], %s212_s8  ;;  %s216_s15 = scalar_lea.vmem (!%p1268_p9), [#allocation2], %s481_s7 }
  0x6b   : > { %799 = dma.done.wait (%p1056_p4), %s213_s9, 64  }
  0x6c   : > { %801 = vsyncadd (%p1056_p4), %s213_s9, 4294967232  ;;  %p1269_p5 = scmp.ne.s32.totalorder %s1254_s29, 0 }
  0x6e   : > { %803 = dma.done.wait (%p1269_p5), [#allocation6], 256  }
  0x6f   : > { %805 = vsyncadd (%p1269_p5), [#allocation6], 4294967040  ;;  %v870_v0 = vmov 0.0   ;;  %vm871_vm0 = vmmov 0   ;;  %v652_v1 = vld [vmem:[#allocation5] sm:$0xff]   ;;  %v653_v2 = vld [vmem:[#allocation5 + $0x8] sm:$0xff]  }
  0x70   : > { %502 = vmatprep.subr.bf16.mxu0 %v870_v0  ;;  %506 = vmatprep.mubr.msk.bf16.mxu0 %vm871_vm0, %v870_v0  ;;  %v250_v3 = vld [vmem:[%s216_s15] sm:$0xf]  ;;  %vm274_vm1 = vcmask 261120   ;;  %p246_p4 = scmp.lt.s32.totalorder %s852_s22, 2  ;;  %s243_s11 = sand.u32 1, %s816_s13   ;;  %vm319_vm2 = vcmask 60416  }
  0x71   : > { %503 = vmatpush3.bf16.msra.mxu0 %v652_v1  ;;  %s482_s18 = sshll.u32 %s243_s11, 4  ;;  %s872_s26 = smov 104  }
  0x72   : > { %504 = vmatprep.subr.bf16.mxu0 %v870_v0  ;;  %s247_s23 = scalar_select %p246_p4, %s852_s22, 2 }
  0x73   : > { %s873_s6 = smov 120   ;;  %s245_s28 = scalar_lea.vmem [#allocation7], %s482_s18 }
  0x74   : > { %s248_s4 = scalar_lea.vmem %s1236_s2, %s247_s23  ;;  %s874_s1 = smov 112  }
  0x75   : > { %505 = vmatpush3.bf16.msra.mxu0 %v653_v2  ;;  %v483_v4 = vld [vmem:[%s248_s4] ss:$0 sm:$0xff]  ;;  %s492_s10 = sshll.u32 %s848_s21, 2  ;;  %s493_s8 = sshll.u32 %s852_s22, 3 }
  0x76   : > { %s353_s7 = sadd.s32 %s493_s8, %s492_s10  ;;  %s356_s9 = sshll.u32 %s245_s28, 4  ;;  %s1148_s9 = int_to_ptr.vmem [resolvable:$true] %s356_s9 }
  0x77   : > { %s494_s15 = sshll.u32 %s353_s7, 6  ;;  %s1158_s22 = scalar_lea.sflag [#allocation4], %s243_s11 }
  0x78   : > { %507 = vmatmul.mubr.msk.bf16.vlgmr.msra.gmra.mrb[0].mxu0 %vm274_vm1, %v250_v3  ;;  %s1153_s21 = scalar_lea.hbm %s1237_s3, %s494_s15  ;;  %s714_s29 = scalar_lea.vmem %s1148_s9, 256 }
  0x79   : > { %p715_p8 = scmp.ne.s32.totalorder %s1148_s9, %s714_s29  ;;  %p1270_p10 = scmp.ne.s32.totalorder %s1265_s27, 0 }
  0x7a   : > { %s875_s4 = smov [#allocation7]  }
  0x7b   : > { %p716_p3 = pnand %p715_p8, %p1270_p10  ;;  %s718_s18 = sshll.u32 %s875_s4, 4  ;;  %s719_s18 = int_to_ptr.vmem [resolvable:$false] %s718_s18 }
  0x7c   : > { %p721_p1 = scmp.lt.s32.totalorder %s1148_s9, %s719_s18 }
  0x7d   : > { %p717_p13 = pneg %p716_p3 }
 0x14b   : > { %v312_v5 = vpop.f32.mrb[0].mxu0 }
 0x14c   : > { %v313_v6 = vadd.f32 %v483_v4, %v312_v5  ;;  %v508_v7 = vpop.f32.mrb[1].mxu0 }
 0x14d   : > { %v315_v8 = vpop.f32.mrb[2].mxu0 }
 0x14e   : > { %v318_v9 = vpack.c.bf16 %v313_v6, %v313_v6  ;;  %v509_v10 = vpop.f32.mrb[3].mxu0 }
 0x150   : > { %334 = vrot.lane.b32.xlu1 %v318_v9, %s872_s26  ;;  %324 = vrot.lane.b32.xlu0 %v318_v9, %s873_s6  ;;  %320 = vst.msk [vmem:[%s245_s28] sm:$0xf] %vm319_vm2, %v318_v9  ;;  %s720_s26 = scalar_lea.vmem %s719_s18, 512 }
 0x151   : > { %p722_p2 = scmp.lt.s32.totalorder %s720_s26, %s714_s29 }
 0x153   : > { %p723_p12 = por %p722_p2, %p721_p1 }
 0x154   : > { %329 = vrot.lane.b32.xlu0 %v318_v9, %s874_s1 }
 0x155   : > { %p724_p7 = pnand %p723_p12, %p717_p13 }
 0x1c2   : > { %v335_v11 = vpop.permute.xlu1 %334  ;;  %v325_v12 = vpop.permute.xlu0 %324 }
 0x1c3   : > { %490 = vst.msk [vmem:[%s245_s28 + $0xc] sm:$0xf] %vm319_vm2, %v335_v11  ;;  %488 = vst.msk [vmem:[%s245_s28 + $0x4] sm:$0xf] %vm319_vm2, %v325_v12 }
 0x1c6   : > { %v330_v13 = vpop.permute.xlu0 %329 }
 0x1c7   : > { %489 = vst.msk [vmem:[%s245_s28 + $0x8] sm:$0xf] %vm319_vm2, %v330_v13 }
 0x1c8   : > { %727 = shalt.err (!%p724_p7)
}
 0x1c9   : > { %s728_s11 = scalar_lea.hbm %s1153_s21, 256  ;;  %s732_s1 = scalar_lea.hbm %s1237_s3, 1536 }
 0x1ca   : > { %p729_p6 = scmp.ne.s32.totalorder %s1153_s21, %s728_s11  ;;  %p733_p9 = scmp.lt.u32.totalorder %s1153_s21, %s1237_s3 }
 0x1cb   : > { %p734_p5 = scmp.lt.u32.totalorder %s732_s1, %s728_s11  ;;  %p736_p8 = scmp.lt.u32.totalorder %s728_s11, %s1153_s21 }
 0x1cc   : > { %p730_p11 = pnand %p729_p6, %p1270_p10 }
 0x1cd   : > { %p735_p4 = por %p734_p5, %p733_p9 }
 0x1ce   : > { %p731_p0 = pneg %p730_p11 }
 0x1cf   : > { %p737_p3 = por %p736_p8, %p735_p4 }
 0x1d1   : > { %p738_p13 = pnand %p737_p3, %p731_p0 }
 0x1d3   : > { %741 = shalt.err (!%p738_p13)
}
 0x1d4   : > { %s876_s7 = smov 64   ;;  %s877_s15 = smov 4  }
 0x1d5   : > { %514 = dma.vmem_to_hbm [thread:$0]  (%p1270_p10), %s1148_s9, 256, %s1153_s21, %s1158_s22, %s876_s7, %s876_s7, %s877_s15  }
 0x1d6 PF: > { %p529_p1 = scmp.ge.s32.totalorder %s864_s25, 2  ;;  %s371_s23 = sand.u32 1, %s812_s12  }
 0x1d7   : > { %p1271_p2 = scmp.ne.s32.totalorder %s1266_s5, 0  ;;  %s372_s24 = scalar_lea.sflag [#allocation4], %s371_s23 }
 0x1d9   : > { %p525_p12 = pnand %p529_p1, %p1271_p2 }
 0x1db   : > { %807 = dma.done.wait (!%p525_p12), %s372_s24, 256  }
 0x1dc   : > { %809 = vsyncadd (!%p525_p12), %s372_s24, 4294967040  ;;  %s20_s25 = sadd.s32 1, %s864_s25   ;;  %s1273_s15 = sld [smem:[#allocation11_spill]] }
 0x1dd   : > { %p1187_p7 = scmp.ge.s32.totalorder %s20_s25, 8   ;;  %s1274_s27 = sld [smem:[#allocation16_spill]] }
 0x1de   : > { %s1275_s21 = sld [smem:[#allocation12_spill]]  ;;  %s1276_s22 = sld [smem:[#allocation13_spill]] }
 0x1df   : > { %s1277_s23 = sld [smem:[#allocation14_spill]]  ;;  %s1278_s24 = sld [smem:[#allocation15_spill]] }
 0x1e0   : > { %s1279_s12 = smov %s816_s13  ;;  %s1280_s13 = smov %s820_s14 }
 0x1e1   : > { %s1281_s14 = smov %s1067_s16  ;;  %s1282_s16 = smov %s832_s17 }
 0x1e2   : > { %s1283_s17 = smov %s1064_s30  ;;  %s1284_s18 = smov %s840_s19 }
 0x1e3   : > { %s1285_s19 = smov %s844_s20  ;;  %s1286_s20 = smov %s1274_s27 }
 0x1e4   :  { %19 = sbr.rel (!%p1187_p7) target bundleno = 13 (0xd), region = 88 }
 0x1eb   :  { %377 = vsyncpa [#allocation3], 1 }
 0x1ec   :  { %379 = vsyncpa [#allocation3 + $0x1], 1 }
 0x1ed   :  { %380 = vsyncpa [#allocation6], 1 }
 0x1ee   :  { %381 = vsyncpa [#allocation4], 1 }
 0x1ef   :  { %383 = vsyncpa [#allocation4 + $0x1], 1 }

// kernel: tpu_custom_call.1
= control target key start
LH: loop header
LB: loop body
LE: loop exit
PB: predicated region body
PF: predicated region fallthrough
CT: control target
= control target key end

     0   :  { %s1267_s0 = inlined_call_operand.hbm [shape: bf16[2,8,32], index: 0, kind: input, shape index: {}]   ;;  %s1268_s1 = inlined_call_operand.hbm [shape: bf16[3,32,32], index: 1, kind: input, shape index: {}]   ;;  %s1269_s2 = inlined_call_operand.vmem [shape: f32[3,1,32], index: 2, kind: input, shape index: {}]   ;;  %s1270_s3 = inlined_call_operand.hbm [shape: bf16[3,2,4,8,8], index: 3, kind: output, shape index: {}]  }
   0x1   :  { %1278 = sst [smem:[#allocation18_spill]] %s1267_s0 }
   0x2   :  { %8 = vsyncpa [#allocation3], 0 }
   0x3   :  { %10 = vsyncpa [#allocation3 + $0x1], 0 }
   0x4   :  { %11 = vsyncpa [#allocation6], 0 }
   0x5   :  { %13 = vsyncpa [#allocation6 + $0x1], 0 }
   0x6   :  { %14 = vsyncpa [#allocation4], 0 }
   0x7   :  { %16 = vsyncpa [#allocation4 + $0x1], 0  ;;  %s923_s12 = smov 0   ;;  %s925_s13 = smov 0  }
   0x8   :  { %s927_s14 = smov 0   ;;  %s929_s15 = smov 0  }
   0x9   :  { %s931_s16 = smov 0   ;;  %s933_s17 = smov 0  }
   0xa   :  { %s935_s18 = smov 0   ;;  %s937_s19 = smov 0  }
   0xb   :  { %s939_s20 = smov 0   ;;  %s941_s21 = smov 0  }
   0xc   :  { %s943_s22 = smov 0   ;;  %s945_s23 = smov 0  }
   0xd   :  { %s947_s24 = smov 0   ;;  %s949_s25 = smov 0  }
   0xe LB: > { %1279 = sst [smem:[#allocation11_spill]] %s881_s23  ;;  %s497_s26 = sadd.s32 4294967295, %s889_s25   ;;  %s889_s25 = sphi %s949_s25, %s22_s25   ;;  %s885_s24 = sphi %s947_s24, %s1310_s24   ;;  %s881_s23 = sphi %s945_s23, %s1321_s23   ;;  %s877_s22 = sphi %s943_s22, %s1308_s22   ;;  %s873_s21 = sphi %s941_s21, %s1320_s21   ;;  %s869_s20 = sphi %s939_s20, %s1319_s20   ;;  %s865_s19 = sphi %s937_s19, %s1318_s19   ;;  %s861_s18 = sphi %s935_s18, %s1317_s18   ;;  %s857_s17 = sphi %s933_s17, %s1316_s17   ;;  %s853_s16 = sphi %s931_s16, %s1315_s16   ;;  %s849_s15 = sphi %s929_s15, %s1314_s15   ;;  %s845_s14 = sphi %s927_s14, %s1313_s14   ;;  %s841_s13 = sphi %s925_s13, %s1312_s13   ;;  %s837_s12 = sphi %s923_s12, %s1311_s12  }
   0xf   : > { %1280 = sst [smem:[#allocation12_spill]] %s885_s24  ;;  %s37_s28 = sadd.s32 1, %s881_s23 }
  0x10   : > { %s41_s29 = sadd.s32 1, %s885_s24  ;;  %p39_p0 = scmp.ge.s32.totalorder %s37_s28, 2 }
  0x11   : > { %s50_s30 = sadd.s32 1, %s869_s20  ;;  %p57_p1 = scmp.ne.s32.totalorder %s869_s20, %s865_s19 }
  0x12   : > { %p58_p2 = scmp.eq.s32.totalorder %s889_s25, 0  ;;  %s1323_s28 = smov (%p39_p0, %s37_s28), 0 }
  0x13   : > { %1281 = sst [smem:[#allocation13_spill]] %s1323_s28  ;;  %s1325_s29 = smov (!%p39_p0, %s41_s29), %s885_s24 }
  0x14   : > { %s45_s4 = ssub.s32 %s881_s23, %s1323_s28  ;;  %p1006_p3 = por %p58_p2, %p57_p1 }
  0x15   : > { %p43_p4 = scmp.ge.s32.totalorder %s1325_s29, 3  ;;  %p48_p5 = scmp.eq.s32.totalorder %s45_s4, 0 }
  0x16   : > { %p63_p6 = scmp.ne.s32.totalorder %s865_s19, %s861_s18  ;;  %p64_p7 = scmp.eq.s32.totalorder %s497_s26, 0 }
  0x17   : > { %s1327_s29 = smov (%p43_p4, %s1325_s29), 0  ;;  %s76_s9 = sadd.s32 1, %s857_s17 }
  0x18   : > { %1283 = sst [smem:[#allocation14_spill]] %s1327_s29  ;;  %p1018_p8 = por %p64_p7, %p63_p6 }
  0x19   : > { %s1016_s6 = scalar_select %p48_p5, %s869_s20, %s50_s30  }
  0x1a   : > { %s1285_s7 = scalar_select %p1018_p8, 1, 0 }
  0x1b   : > { %1284 = sst [smem:[#allocation15_spill]] %s1016_s6  ;;  %s73_s8 = ssub.s32 %s885_s24, %s1327_s29 }
  0x1c   : > { %p74_p9 = scmp.eq.s32.totalorder %s73_s8, 0  ;;  %p83_p10 = scmp.ne.s32.totalorder %s857_s17, %s853_s16 }
  0x1d   : > { %p89_p11 = scmp.ne.s32.totalorder %s853_s16, %s849_s15  ;;  %s127_s30 = sor.u32 %s73_s8, %s45_s4 }
  0x1e   : > { %s1030_s10 = scalar_select %p74_p9, %s857_s17, %s76_s9  }
  0x1f   : > { %p1034_p12 = por %p83_p10, %p58_p2  ;;  %p1038_p13 = por %p89_p11, %p64_p7 }
  0x20   : > { %1286 = sst [smem:[#allocation16_spill]] %s1030_s10  ;;  %s132_s27 = sadd.s32 1, %s845_s14 }
  0x21   : > { %s1288_s18 = scalar_select %p1038_p13, 1, 0 }
  0x22   : > { %p130_p0 = scmp.eq.s32.totalorder %s127_s30, 0  ;;  %p142_p1 = scmp.ne.s32.totalorder %s845_s14, %s841_s13 }
  0x23   : > { %p143_p4 = scmp.eq.s32.totalorder %s497_s26, 5  ;;  %p148_p5 = scmp.ne.s32.totalorder %s841_s13, %s837_s12 }
  0x24   : > { %s1050_s15 = scalar_select %p130_p0, %s845_s14, %s132_s27  }
  0x25   : > { %p1052_p2 = por %p143_p4, %p142_p1  ;;  %s1291_s29 = sadd.s32 4294967294, %s889_s25  }
  0x26   : > { %1289 = sst [smem:[#allocation17_spill]] %s1050_s15  ;;  %p149_p6 = scmp.eq.s32.totalorder %s1291_s29, 5 }
  0x27   : > { %s1290_s9 = scalar_select %p1052_p2, 1, 0 }
  0x28   : > { %p554_p7 = scmp.lt.s32.totalorder %s889_s25, 6  ;;  %p1059_p9 = por %p149_p6, %p148_p5 }
  0x29   : > { %s169_s8 = sand.u32 1, %s869_s20   ;;  %s502_s28 = sshll.u32 %s881_s23, 6 }
  0x2a   : > { %s1292_s4 = scalar_select %p1059_p9, 1, 0 }
  0x2b   : > { %s501_s30 = sshll.u32 %s169_s8, 2  ;;  %s1293_s0 = sld [smem:[#allocation18_spill]] }
  0x2c   : > { %s173_s27 = scalar_lea.vmem [#allocation2], %s501_s30  ;;  %p1074_p10 = pnand %p554_p7, %p1006_p3 }
  0x2d   : > { %s181_s15 = sshll.u32 %s173_s27, 4  ;;  %p1080_p11 = pnand %p554_p7, %p1034_p12  ;;  %s1070_s15 = int_to_ptr.vmem [resolvable:$true] %s181_s15 }
  0x2e   : > { %p681_p5 = pneg %p1074_p10 }
  0x31   : > { %s1068_s10 = scalar_lea.hbm %s1293_s0, %s502_s28  ;;  %s170_s28 = scalar_lea.sflag [#allocation3], %s169_s8 }
  0x32   : > { %s679_s30 = scalar_lea.hbm %s1068_s10, 64  ;;  %s684_s11 = scalar_lea.hbm %s1293_s0, 128 }
  0x33   : > { %p680_p4 = scmp.ne.s32.totalorder %s1068_s10, %s679_s30  ;;  %p685_p12 = scmp.lt.u32.totalorder %s1068_s10, %s1293_s0 }
  0x34   : > { %p686_p7 = scmp.lt.u32.totalorder %s684_s11, %s679_s30  ;;  %p688_p1 = scmp.lt.u32.totalorder %s679_s30, %s1068_s10 }
  0x35   : > { %p682_p3 = pnand %p681_p5, %p680_p4 }
  0x36   : > { %p687_p0 = por %p686_p7, %p685_p12 }
  0x37   : > { %p683_p6 = pneg %p682_p3 }
  0x38   : > { %p689_p9 = por %p688_p1, %p687_p0 }
  0x3a   : > { %p690_p2 = pnand %p689_p9, %p683_p6 }
  0x3c   : > { %693 = shalt.err (!%p690_p2)
}
  0x3d   : > { %s694_s8 = scalar_lea.vmem %s1070_s15, 64  ;;  %s891_s5 = smov [#allocation2]  }
  0x3e   : > { %p695_p4 = scmp.ne.s32.totalorder %s1070_s15, %s694_s8  ;;  %s699_s26 = sshll.u32 %s891_s5, 4  ;;  %s700_s26 = int_to_ptr.vmem [resolvable:$false] %s699_s26 }
  0x3f   : > { %s701_s23 = scalar_lea.vmem %s700_s26, 128  ;;  %p702_p8 = scmp.lt.s32.totalorder %s1070_s15, %s700_s26 }
  0x40   : > { %p697_p3 = pnand %p695_p4, %p681_p5  ;;  %p703_p12 = scmp.lt.s32.totalorder %s701_s23, %s694_s8 }
  0x42   : > { %p698_p13 = pneg %p697_p3  ;;  %p704_p7 = por %p703_p12, %p702_p8 }
  0x44   : > { %p705_p0 = pnand %p704_p7, %p698_p13 }
  0x46   : > { %708 = shalt.err (!%p705_p0)
}
  0x47   : > { %546 = dma.hbm_to_vmem [thread:$0]  (!%p1074_p10), %s1068_s10, 64, %s1070_s15, %s170_s28  }
  0x48   : > { %p1296_p2 = scmp.lt.s32.totalorder %s889_s25, 7  ;;  %p1297_p9 = scmp.ge.s32.totalorder %s889_s25, 1 }
  0x49   : > { %s188_s11 = sand.u32 1, %s857_s17   ;;  %s524_s27 = sshll.u32 %s885_s24, 8 }
  0x4a   : > { %p1115_p1 = pnand %p1297_p9, %p1296_p2  ;;  %s503_s8 = sshll.u32 %s188_s11, 4 }
  0x4b   : > { %s1124_s26 = scalar_lea.hbm %s1268_s1, %s524_s27  ;;  %s192_s23 = scalar_lea.vmem [#allocation5], %s503_s8 }
  0x4c   : > { %s199_s10 = sshll.u32 %s192_s23, 4  ;;  %s1128_s15 = scalar_lea.sflag [#allocation6], %s188_s11  ;;  %s1126_s10 = int_to_ptr.vmem [resolvable:$true] %s199_s10 }
  0x4d   : > { %s709_s28 = scalar_lea.hbm %s1124_s26, 256  ;;  %p711_p13 = pneg %p1080_p11 }
  0x4e   : > { %p710_p8 = scmp.ne.s32.totalorder %s1124_s26, %s709_s28  ;;  %s714_s29 = scalar_lea.hbm %s1268_s1, 768 }
  0x4f   : > { %p715_p6 = scmp.lt.u32.totalorder %s1124_s26, %s1268_s1  ;;  %p716_p4 = scmp.lt.u32.totalorder %s714_s29, %s709_s28 }
  0x50   : > { %p712_p10 = pnand %p711_p13, %p710_p8  ;;  %p718_p12 = scmp.lt.u32.totalorder %s709_s28, %s1124_s26 }
  0x51   : > { %p717_p3 = por %p716_p4, %p715_p6 }
  0x52   : > { %p713_p5 = pneg %p712_p10 }
  0x53   : > { %p719_p7 = por %p718_p12, %p717_p3 }
  0x55   : > { %p720_p0 = pnand %p719_p7, %p713_p5 }
  0x57   : > { %723 = shalt.err (!%p720_p0)
}
  0x58   : > { %s724_s11 = scalar_lea.vmem %s1126_s10, 256  ;;  %s892_s8 = smov [#allocation5]  }
  0x59   : > { %p725_p2 = scmp.ne.s32.totalorder %s1126_s10, %s724_s11  ;;  %s729_s23 = sshll.u32 %s892_s8, 4  ;;  %s730_s23 = int_to_ptr.vmem [resolvable:$false] %s729_s23 }
  0x5a   : > { %s731_s0 = scalar_lea.vmem %s730_s23, 512  ;;  %p732_p10 = scmp.lt.s32.totalorder %s1126_s10, %s730_s23 }
  0x5b   : > { %p727_p9 = pnand %p725_p2, %p711_p13  ;;  %p733_p6 = scmp.lt.s32.totalorder %s731_s0, %s724_s11 }
  0x5d   : > { %p728_p8 = pneg %p727_p9  ;;  %p734_p4 = por %p733_p6, %p732_p10 }
  0x5f   : > { %p735_p3 = pnand %p734_p4, %p728_p8 }
  0x61   : > { %738 = shalt.err (!%p735_p3)
}
  0x62   : > { %s893_s24 = smov 64   ;;  %s894_s28 = smov 4  }
  0x63   : > { %549 = dma.hbm_to_vmem [thread:$0]  (!%p1080_p11), %s1124_s26, 256, %s1126_s10, %s1128_s15, %s893_s24, %s893_s24, %s894_s28  }
  0x64   : > { %217 = sbr.rel (%p1115_p1) target bundleno = 471 (0x1d7), region = 32  ;;  %s219_s27 = sand.u32 (!%p1115_p1), 1, %s865_s19  }
  0x65   : > { %s507_s5 = sshll.u32 (!%p1115_p1), %s219_s27, 2  ;;  %s220_s29 = scalar_lea.sflag (!%p1115_p1), [#allocation3], %s219_s27 }
  0x66   : > { %s223_s11 = scalar_lea.vmem (!%p1115_p1), [#allocation2], %s507_s5  ;;  %p1299_p13 = scmp.ne.s32.totalorder (!%p1115_p1), %s1285_s7, 0 }
  0x6b   : > { %824 = dma.done.wait (%p1299_p13), %s220_s29, 64  }
  0x6c   : > { %826 = vsyncadd (%p1299_p13), %s220_s29, 4294967232  ;;  %s228_s8 = sand.u32 1, %s853_s16   ;;  %p1300_p11 = scmp.ne.s32.totalorder %s1288_s18, 0 }
  0x6d   : > { %s508_s23 = sshll.u32 %s228_s8, 4  ;;  %s229_s6 = scalar_lea.sflag [#allocation6], %s228_s8 }
  0x6e   : > { %s232_s26 = scalar_lea.vmem [#allocation5], %s508_s23 }
  0x6f   : > { %828 = dma.done.wait (%p1300_p11), %s229_s6, 256  }
  0x70   : > { %830 = vsyncadd (%p1300_p11), %s229_s6, 4294967040  ;;  %v895_v0 = vmov 0.0   ;;  %vm896_vm0 = vmmov 0   ;;  %v677_v1 = vld [vmem:[%s232_s26] sm:$0xff]   ;;  %v678_v2 = vld [vmem:[%s232_s26 + $0x8] sm:$0xff]   ;;  %vm291_vm1 = vcmask 261120  }
  0x71   : > { %529 = vmatprep.subr.bf16.mxu0 %v895_v0  ;;  %533 = vmatprep.mubr.msk.bf16.mxu0 %vm896_vm0, %v895_v0  ;;  %v267_v3 = vld [vmem:[%s223_s11] sm:$0xf]  ;;  %p263_p1 = scmp.lt.s32.totalorder %s877_s22, 2  ;;  %s260_s15 = sand.u32 1, %s841_s13   ;;  %vm336_vm2 = vcmask 60416  }
  0x72   : > { %530 = vmatpush3.bf16.msra.mxu0 %v677_v1  ;;  %s509_s0 = sshll.u32 %s260_s15, 4  ;;  %s897_s24 = smov 104  }
  0x73   : > { %531 = vmatprep.subr.bf16.mxu0 %v895_v0  ;;  %s264_s7 = scalar_select %p263_p1, %s877_s22, 2 }
  0x74   : > { %s898_s28 = smov 120   ;;  %s262_s27 = scalar_lea.vmem [#allocation7], %s509_s0 }
  0x75   : > { %s265_s10 = scalar_lea.vmem %s1269_s2, %s264_s7  ;;  %s899_s5 = smov 112  }
  0x76   : > { %532 = vmatpush3.bf16.msra.mxu0 %v678_v2  ;;  %v510_v4 = vld [vmem:[%s265_s10] ss:$0 sm:$0xff]  ;;  %s519_s29 = sshll.u32 %s873_s21, 2  ;;  %s520_s11 = sshll.u32 %s877_s22, 3 }
  0x77   : > { %s370_s8 = sadd.s32 %s520_s11, %s519_s29  ;;  %s373_s23 = sshll.u32 %s262_s27, 4  ;;  %s1181_s23 = int_to_ptr.vmem [resolvable:$true] %s373_s23 }
  0x78   : > { %s521_s6 = sshll.u32 %s370_s8, 6  ;;  %s1191_s22 = scalar_lea.sflag [#allocation4], %s260_s15 }
  0x79   : > { %534 = vmatmul.mubr.msk.bf16.vlgmr.msra.gmra.mrb[0].mxu0 %vm291_vm1, %v267_v3  ;;  %s1186_s21 = scalar_lea.hbm %s1270_s3, %s521_s6  ;;  %s739_s18 = scalar_lea.vmem %s1181_s23, 256 }
  0x7a   : > { %p740_p5 = scmp.ne.s32.totalorder %s1181_s23, %s739_s18  ;;  %p1301_p12 = scmp.ne.s32.totalorder %s1290_s9, 0 }
  0x7b   : > { %s900_s30 = smov [#allocation7]  }
  0x7c   : > { %p741_p7 = pnand %p740_p5, %p1301_p12  ;;  %s743_s10 = sshll.u32 %s900_s30, 4  ;;  %s744_s10 = int_to_ptr.vmem [resolvable:$false] %s743_s10 }
  0x7d   : > { %s745_s0 = scalar_lea.vmem %s744_s10, 512  ;;  %p746_p2 = scmp.lt.s32.totalorder %s1181_s23, %s744_s10 }
  0x7e   : > { %p742_p0 = pneg %p741_p7  ;;  %p747_p9 = scmp.lt.s32.totalorder %s745_s0, %s739_s18 }
  0x80   : > { %p748_p8 = por %p747_p9, %p746_p2 }
  0x82   : > { %p749_p10 = pnand %p748_p8, %p742_p0 }
 0x14c   : > { %v329_v5 = vpop.f32.mrb[0].mxu0 }
 0x14d   : > { %v330_v6 = vadd.f32 %v510_v4, %v329_v5  ;;  %v535_v7 = vpop.f32.mrb[1].mxu0 }
 0x14e   : > { %v332_v8 = vpop.f32.mrb[2].mxu0 }
 0x14f   : > { %v335_v9 = vpack.c.bf16 %v330_v6, %v330_v6  ;;  %v536_v10 = vpop.f32.mrb[3].mxu0 }
 0x151   : > { %351 = vrot.lane.b32.xlu1 %v335_v9, %s897_s24  ;;  %341 = vrot.lane.b32.xlu0 %v335_v9, %s898_s28  ;;  %337 = vst.msk [vmem:[%s262_s27] sm:$0xf] %vm336_vm2, %v335_v9 }
 0x155   : > { %346 = vrot.lane.b32.xlu0 %v335_v9, %s899_s5 }
 0x1c3   : > { %v352_v11 = vpop.permute.xlu1 %351  ;;  %v342_v12 = vpop.permute.xlu0 %341 }
 0x1c4   : > { %517 = vst.msk [vmem:[%s262_s27 + $0xc] sm:$0xf] %vm336_vm2, %v352_v11  ;;  %515 = vst.msk [vmem:[%s262_s27 + $0x4] sm:$0xf] %vm336_vm2, %v342_v12 }
 0x1c7   : > { %v347_v13 = vpop.permute.xlu0 %346 }
 0x1c8   : > { %516 = vst.msk [vmem:[%s262_s27 + $0x8] sm:$0xf] %vm336_vm2, %v347_v13 }
 0x1c9   : > { %752 = shalt.err (!%p749_p10)
}
 0x1ca   : > { %s753_s15 = scalar_lea.hbm %s1186_s21, 256  ;;  %s757_s27 = scalar_lea.hbm %s1270_s3, 1536 }
 0x1cb   : > { %p754_p6 = scmp.ne.s32.totalorder %s1186_s21, %s753_s15  ;;  %p758_p13 = scmp.lt.u32.totalorder %s1186_s21, %s1270_s3 }
 0x1cc   : > { %p759_p11 = scmp.lt.u32.totalorder %s757_s27, %s753_s15  ;;  %p761_p5 = scmp.lt.u32.totalorder %s753_s15, %s1186_s21 }
 0x1cd   : > { %p755_p4 = pnand %p754_p6, %p1301_p12 }
 0x1ce   : > { %p760_p1 = por %p759_p11, %p758_p13 }
 0x1cf   : > { %p756_p3 = pneg %p755_p4 }
 0x1d0   : > { %p762_p7 = por %p761_p5, %p760_p1 }
 0x1d2   : > { %p763_p0 = pnand %p762_p7, %p756_p3 }
 0x1d4   : > { %766 = shalt.err (!%p763_p0)
}
 0x1d5   : > { %s901_s11 = smov 64   ;;  %s902_s8 = smov 4  }
 0x1d6   : > { %541 = dma.vmem_to_hbm [thread:$0]  (%p1301_p12), %s1181_s23, 256, %s1186_s21, %s1191_s22, %s901_s11, %s901_s11, %s902_s8  }
 0x1d7 PF: > { %p555_p2 = scmp.ge.s32.totalorder %s889_s25, 2  ;;  %s388_s6 = sand.u32 1, %s837_s12  }
 0x1d8   : > { %p1302_p9 = scmp.ne.s32.totalorder %s1292_s4, 0  ;;  %s389_s26 = scalar_lea.sflag [#allocation4], %s388_s6 }
 0x1da   : > { %p551_p8 = pnand %p555_p2, %p1302_p9 }
 0x1dc   : > { %832 = dma.done.wait (!%p551_p8), %s389_s26, 256  }
 0x1dd   : > { %834 = vsyncadd (!%p551_p8), %s389_s26, 4294967040  ;;  %s22_s25 = sadd.s32 1, %s889_s25   ;;  %s1304_s9 = sld [smem:[#allocation17_spill]] }
 0x1de   : > { %p1220_p10 = scmp.ge.s32.totalorder %s22_s25, 8   ;;  %s1305_s23 = sld [smem:[#allocation16_spill]] }
 0x1df   : > { %s1306_s21 = sld [smem:[#allocation15_spill]]  ;;  %s1307_s4 = sld [smem:[#allocation11_spill]] }
 0x1e0   : > { %s1308_s22 = sld [smem:[#allocation12_spill]]  ;;  %s1309_s30 = sld [smem:[#allocation13_spill]] }
 0x1e1   : > { %s1310_s24 = sld [smem:[#allocation14_spill]]  ;;  %s1311_s12 = smov %s841_s13 }
 0x1e2   : > { %s1312_s13 = smov %s845_s14  ;;  %s1314_s15 = smov %s853_s16 }
 0x1e3   : > { %s1313_s14 = smov %s1304_s9  ;;  %s1315_s16 = smov %s857_s17 }
 0x1e4   : > { %s1316_s17 = smov %s1305_s23  ;;  %s1317_s18 = smov %s865_s19 }
 0x1e5   : > { %s1318_s19 = smov %s869_s20  ;;  %s1319_s20 = smov %s1306_s21 }
 0x1e6   : > { %s1320_s21 = smov %s1307_s4  ;;  %s1321_s23 = smov %s1309_s30 }
 0x1e7   :  { %21 = sbr.rel (!%p1220_p10) target bundleno = 14 (0xe), region = 96 }
 0x1ee   :  { %394 = vsyncpa [#allocation3], 1 }
 0x1ef   :  { %396 = vsyncpa [#allocation3 + $0x1], 1 }
 0x1f0   :  { %397 = vsyncpa [#allocation6], 1 }
 0x1f1   :  { %399 = vsyncpa [#allocation6 + $0x1], 1 }
 0x1f2   :  { %400 = vsyncpa [#allocation4], 1 }
 0x1f3   :  { %402 = vsyncpa [#allocation4 + $0x1], 1 }

</bundles_post_ra>
